<compile_context>
chip_gen: v5e
topology: v5e:2x2
jax: 0.10.0
libtpu: 0.0.40
codegen_flags: <defaults>
</compile_context>

<pallas_src>
import functools

import jax
import jax.numpy as jnp
import numpy as np
from jax.experimental import pallas as pl
from jax.experimental.pallas import tpu as pltpu

_EPS = 1e-5
_LANE = 128


def _round_up(n, m):
    return ((n + m - 1) // m) * m


# ---------------------------------------------------------------------------
# Fused kernel: all hidden layers + merged head matmul + masked epilogues.
# Everything fits comfortably in VMEM at these shapes -> single invocation,
# whole-array blocks.
# ---------------------------------------------------------------------------
def _make_fused_kernel(num_hidden, head_specs):
    """head_specs: tuple of (dist, start_col, dim) — static Python values."""
    any_bernoulli = any(d == "bernoulli" for (d, _, _) in head_specs)

    def kernel(*refs):
        # refs = [x, (W_i, gb_i) * num_hidden, W_heads, b_heads, out]
        x_ref = refs[0]
        idx = 1

        h = x_ref[...]                                  # f32 (B, in)
        for _ in range(num_hidden):
            w_ref = refs[idx]          # (in_pad, h_pad)  bf16
            gb_ref = refs[idx + 1]     # (2, h_pad)       rows = [gamma, beta]
            idx += 2

            # Linear bias is omitted: under train-mode BN it cancels exactly.
            y = jnp.dot(h.astype(jnp.bfloat16), w_ref[...],
                        preferred_element_type=jnp.float32)

            # BatchNorm1d, training-mode batch statistics, biased variance.
            # Single-pass variance: one reduction sweep over y.
            mean = jnp.mean(y, axis=0, keepdims=True)
            mean_sq = jnp.mean(y * y, axis=0, keepdims=True)
            var = jnp.maximum(mean_sq - mean * mean, 0.0)

            # Folded affine: one FMA-shaped pass over (B, h_pad).
            scale = gb_ref[0:1, :] * jax.lax.rsqrt(var + _EPS)   # gamma*rsqrt
            shift = gb_ref[1:2, :] - mean * scale                # beta - mean*scale
            h = jnp.maximum(y * scale + shift, 0.0)              # ReLU

        wh_ref = refs[idx]       # (h_pad, n_pad)  all heads concatenated + padded, bf16
        bh_ref = refs[idx + 1]   # (1, n_pad)      f32
        o_ref = refs[idx + 2]    # (B, n_pad)      lane-dense output slab

        logits = jnp.dot(h.astype(jnp.bfloat16), wh_ref[...],
                         preferred_element_type=jnp.float32)
        logits = logits + bh_ref[...]

        # One shared sigmoid pass covers the union of all bernoulli lanes
        # (padding lanes get sigmoid too; they are sliced away in the wrapper).
        if any_bernoulli:
            out = 1.0 / (1.0 + jnp.exp(-logits))
        else:
            out = jnp.zeros_like(logits)

        # Per-head masked softmax only for categorical heads. Exact divide.
        lane = jax.lax.broadcasted_iota(jnp.int32, logits.shape, 1)
        for (dist, start, dim) in head_specs:
            if dist != "categorical":
                continue
            in_head = (lane >= start) & (lane < start + dim)
            ml = jnp.where(in_head, logits, -1e30)
            m = jnp.max(ml, axis=-1, keepdims=True)
            e = jnp.exp(ml - m)                     # masked lanes underflow to 0
            denom = jnp.sum(e, axis=-1, keepdims=True)
            out = jnp.where(in_head, e / denom, out)

        o_ref[...] = out

    return kernel


# ---------------------------------------------------------------------------
# Parameter init (deterministic, PyTorch-style uniform(+-1/sqrt(fan_in)))
# ---------------------------------------------------------------------------
def _init_linear(key, fan_in, fan_out):
    k_w, k_b = jax.random.split(key)
    bound = 1.0 / np.sqrt(fan_in)
    w = jax.random.uniform(k_w, (fan_in, fan_out), jnp.float32, -bound, bound)
    b = jax.random.uniform(k_b, (fan_out,), jnp.float32, -bound, bound)
    return w, b


def init_classifier_params(key, input_dim, outputs, hidden_dims, hidden_layers):
    params = {"hidden": [], "heads": []}
    keys = jax.random.split(key, hidden_layers + len(outputs))
    for i in range(hidden_layers):
        i1 = input_dim if i == 0 else hidden_dims
        w, b = _init_linear(keys[i], i1, hidden_dims)
        gamma = jnp.ones((hidden_dims,), jnp.float32)
        beta = jnp.zeros((hidden_dims,), jnp.float32)
        params["hidden"].append((w, b, gamma, beta))
    for j, o in enumerate(outputs):
        w, b = _init_linear(keys[hidden_layers + j], hidden_dims, o["dim"])
        params["heads"].append((o["dist"], w, b))
    return params


def pack_classifier_params(params):
    """Pack params for the fused kernel (done once, outside the hot path)."""
    hidden_dims = params["hidden"][0][0].shape[1]
    h_pad = _round_up(hidden_dims, _LANE)   # lane-dense resident activations

    hidden = []
    for i, (w, b, gamma, beta) in enumerate(params["hidden"]):
        fan_in = w.shape[0]
        in_pad = fan_in if i == 0 else h_pad
        w_p = jnp.zeros((in_pad, h_pad), jnp.bfloat16)
        w_p = w_p.at[:fan_in, :hidden_dims].set(w.astype(jnp.bfloat16))
        gb = jnp.zeros((2, h_pad), jnp.float32)
        gb = gb.at[0, :hidden_dims].set(gamma)
        gb = gb.at[1, :hidden_dims].set(beta)
        # NOTE: Linear bias b intentionally dropped (cancelled by BN).
        hidden.append((w_p, gb))

    head_specs = []
    ws, bs = [], []
    start = 0
    for (dist, w, b) in params["heads"]:
        if dist not in ("bernoulli", "categorical"):
            raise ValueError(f"unknown dist {dist}")
        dim = w.shape[1]
        head_specs.append((dist, start, dim))
        ws.append(w)
        bs.append(b)
        start += dim

    n_pad = max(_LANE, _round_up(start, _LANE))
    head_w = jnp.zeros((h_pad, n_pad), jnp.bfloat16)
    head_w = head_w.at[:hidden_dims, :start].set(
        jnp.concatenate(ws, axis=1).astype(jnp.bfloat16))
    head_b = jnp.zeros((1, n_pad), jnp.float32)
    head_b = head_b.at[0, :start].set(jnp.concatenate(bs, axis=0))

    return {
        "hidden": hidden,
        "head_w": head_w,
        "head_b": head_b,
        "head_specs": tuple(head_specs),
        "n_pad": n_pad,
    }


# ---------------------------------------------------------------------------
# Forward pass: one fused pallas_call, then cheap per-head slicing.
# ---------------------------------------------------------------------------
@functools.partial(jax.jit, static_argnums=(4, 5))
def _forward_impl(x, hidden, head_w, head_b, head_specs, n_pad):
    B = x.shape[0]
    args = [x]
    for (w, gb) in hidden:
        args.extend([w, gb])
    args.extend([head_w, head_b])

    kernel = _make_fused_kernel(len(hidden), head_specs)
    slab = pl.pallas_call(
        kernel,
        out_shape=jax.ShapeDtypeStruct((B, n_pad), jnp.float32),
        in_specs=[pl.BlockSpec(memory_space=pltpu.MemorySpace.VMEM)
                  for _ in args],
        out_specs=pl.BlockSpec(memory_space=pltpu.MemorySpace.VMEM),
    )(*args)

    return [slab[:, s:s + d] for (_, s, d) in head_specs]


def classifier_forward(x, packed):
    return _forward_impl(x, packed["hidden"], packed["head_w"],
                         packed["head_b"], packed["head_specs"],
                         packed["n_pad"])


# ---------------------------------------------------------------------------
# References for the in-script correctness checks.
# ---------------------------------------------------------------------------
def matched_reference(x, params):
    """Pure-JAX mirror of the kernel math (bf16 dots, no hidden bias,
    single-pass var) — tight comparison target."""
    h = x
    for (w, b, gamma, beta) in params["hidden"]:
        y = jnp.dot(h.astype(jnp.bfloat16), w.astype(jnp.bfloat16),
                    preferred_element_type=jnp.float32)
        mean = jnp.mean(y, axis=0, keepdims=True)
        var = jnp.maximum(jnp.mean(y * y, axis=0, keepdims=True) - mean * mean,
                          0.0)
        scale = gamma * jax.lax.rsqrt(var + _EPS)
        shift = beta - mean * scale
        h = jnp.maximum(y * scale + shift, 0.0)
    outs = []
    for (dist, w, b) in params["heads"]:
        y = jnp.dot(h.astype(jnp.bfloat16), w.astype(jnp.bfloat16),
                    preferred_element_type=jnp.float32) + b
        if dist == "bernoulli":
            outs.append(1.0 / (1.0 + jnp.exp(-y)))
        else:
            outs.append(jax.nn.softmax(y, axis=-1))
    return outs


def reference_forward_f32(x, params):
    """PyTorch-equivalent full-f32 reference (with the hidden bias that BN
    cancels) — coarse semantic check, tolerance covers bf16-operand drift."""
    h = x
    for (w, b, gamma, beta) in params["hidden"]:
        y = h @ w + b
        mean = jnp.mean(y, axis=0, keepdims=True)
        var = jnp.mean((y - mean) ** 2, axis=0, keepdims=True)
        h = jnp.maximum((y - mean) / jnp.sqrt(var + _EPS) * gamma + beta, 0.0)
    outs = []
    for (dist, w, b) in params["heads"]:
        y = h @ w + b
        if dist == "bernoulli":
            outs.append(jax.nn.sigmoid(y))
        else:
            outs.append(jax.nn.softmax(y, axis=-1))
    return outs


# ---------------------------------------------------------------------------
if __name__ == "__main__":
    # Small shapes consistent with the module: x is (batch, input_dim)
    batch = 8
    input_dim = 16
    hidden_dims = 32
    hidden_layers = 2
    outputs = [
        {"dist": "bernoulli", "dim": 4},    # Linear -> Sigmoid head
        {"dist": "categorical", "dim": 5},  # Linear -> Softmax head
    ]

    key = jax.random.PRNGKey(0)
    k_x, k_p = jax.random.split(key)
    x = jax.random.normal(k_x, (batch, input_dim), jnp.float32)

    params = init_classifier_params(k_p, input_dim, outputs, hidden_dims,
                                    hidden_layers)
    packed = pack_classifier_params(params)

    outs = classifier_forward(x, packed)
    for o in outs:
        jax.block_until_ready(o)

    assert outs[0].shape == (batch, 4)
    assert outs[1].shape == (batch, 5)

    # Tight check vs. a reference that mirrors the kernel numerics exactly.
    refs_m = matched_reference(x, params)
    for got, ref in zip(outs, refs_m):
        assert bool(jnp.allclose(got, ref, atol=1e-3, rtol=1e-3)), \
            f"matched-ref mismatch: max abs err {jnp.max(jnp.abs(got - ref))}"

    # Coarse semantic check vs. the full-f32 PyTorch-equivalent forward
    # (tolerance absorbs bf16 MXU-operand drift through 2 BN'd layers).
    refs_f32 = reference_forward_f32(x, params)
    for got, ref in zip(outs, refs_f32):
        assert bool(jnp.allclose(got, ref, atol=0.1)), \
            f"f32-ref mismatch: max abs err {jnp.max(jnp.abs(got - ref))}"

    # Probability invariants (exact divide -> these hold tightly).
    assert bool(jnp.all((outs[0] >= 0.0) & (outs[0] <= 1.0)))
    assert bool(jnp.allclose(jnp.sum(outs[1], axis=-1), 1.0, atol=1e-3))

    print("KERNEL_OK")
</pallas_src>

<mosaic_0001>
module attributes {stable_mosaic.version = 11 : i64} {
  func.func @kernel(%arg0: memref<8x16xf32, #tpu.memory_space<vmem>>, %arg1: memref<16x128xbf16, #tpu.memory_space<vmem>>, %arg2: memref<2x128xf32, #tpu.memory_space<vmem>>, %arg3: memref<128x128xbf16, #tpu.memory_space<vmem>>, %arg4: memref<2x128xf32, #tpu.memory_space<vmem>>, %arg5: memref<128x128xbf16, #tpu.memory_space<vmem>>, %arg6: memref<1x128xf32, #tpu.memory_space<vmem>>, %arg7: memref<8x128xf32, #tpu.memory_space<vmem>>) attributes {dimension_semantics = [], scalar_prefetch = 0 : i64, scratch_operands = 0 : i64, tpu.core_type = #tpu.core_type<tc>} {
    %c0 = arith.constant 0 : index
    %c0_0 = arith.constant 0 : index
    %0 = vector.load %arg0[%c0, %c0_0] : memref<8x16xf32, #tpu.memory_space<vmem>>, vector<8x16xf32>
    %1 = arith.truncf %0 : vector<8x16xf32> to vector<8x16xbf16>
    %c0_1 = arith.constant 0 : index
    %c0_2 = arith.constant 0 : index
    %2 = vector.load %arg1[%c0_1, %c0_2] : memref<16x128xbf16, #tpu.memory_space<vmem>>, vector<16x128xbf16>
    %cst = arith.constant dense<0.000000e+00> : vector<8x128xf32>
    %3 = tpu.matmul %1, %2, %cst {dimension_numbers = #tpu.dot_dimension_numbers<[1], [0], [0], [1], [0, 0, 1, 1], [], []>} : vector<8x16xbf16>, vector<16x128xbf16>, vector<8x128xf32> -> vector<8x128xf32>
    %cst_3 = arith.constant dense<0.000000e+00> : vector<128xf32>
    %4 = vector.multi_reduction <add>, %3, %cst_3 [0] : vector<8x128xf32> to vector<128xf32>
    %5 = vector.shape_cast %4 : vector<128xf32> to vector<1x128xf32>
    %cst_4 = arith.constant 8.000000e+00 : f32
    %6 = vector.broadcast %cst_4 : f32 to vector<1x128xf32>
    %7 = arith.divf %5, %6 : vector<1x128xf32>
    %8 = arith.mulf %3, %3 : vector<8x128xf32>
    %cst_5 = arith.constant dense<0.000000e+00> : vector<128xf32>
    %9 = vector.multi_reduction <add>, %8, %cst_5 [0] : vector<8x128xf32> to vector<128xf32>
    %10 = vector.shape_cast %9 : vector<128xf32> to vector<1x128xf32>
    %cst_6 = arith.constant 8.000000e+00 : f32
    %11 = vector.broadcast %cst_6 : f32 to vector<1x128xf32>
    %12 = arith.divf %10, %11 : vector<1x128xf32>
    %13 = arith.mulf %7, %7 : vector<1x128xf32>
    %14 = arith.subf %12, %13 : vector<1x128xf32>
    %cst_7 = arith.constant 0.000000e+00 : f32
    %15 = vector.broadcast %cst_7 : f32 to vector<1x128xf32>
    %16 = arith.maximumf %14, %15 : vector<1x128xf32>
    %c0_8 = arith.constant 0 : index
    %c0_9 = arith.constant 0 : index
    %17 = vector.load %arg2[%c0_8, %c0_9] : memref<2x128xf32, #tpu.memory_space<vmem>>, vector<1x128xf32>
    %cst_10 = arith.constant 9.99999974E-6 : f32
    %18 = vector.broadcast %cst_10 : f32 to vector<1x128xf32>
    %19 = arith.addf %16, %18 : vector<1x128xf32>
    %20 = math.rsqrt %19 : vector<1x128xf32>
    %21 = arith.mulf %17, %20 : vector<1x128xf32>
    %c1 = arith.constant 1 : index
    %c0_11 = arith.constant 0 : index
    %22 = vector.load %arg2[%c1, %c0_11] : memref<2x128xf32, #tpu.memory_space<vmem>>, vector<1x128xf32>
    %23 = arith.mulf %7, %21 : vector<1x128xf32>
    %24 = arith.subf %22, %23 : vector<1x128xf32>
    %25 = vector.broadcast %21 : vector<1x128xf32> to vector<8x128xf32>
    %26 = arith.mulf %3, %25 : vector<8x128xf32>
    %27 = vector.broadcast %24 : vector<1x128xf32> to vector<8x128xf32>
    %28 = arith.addf %26, %27 : vector<8x128xf32>
    %cst_12 = arith.constant 0.000000e+00 : f32
    %29 = vector.broadcast %cst_12 : f32 to vector<8x128xf32>
    %30 = arith.maximumf %28, %29 : vector<8x128xf32>
    %31 = arith.truncf %30 : vector<8x128xf32> to vector<8x128xbf16>
    %c0_13 = arith.constant 0 : index
    %c0_14 = arith.constant 0 : index
    %32 = vector.load %arg3[%c0_13, %c0_14] : memref<128x128xbf16, #tpu.memory_space<vmem>>, vector<128x128xbf16>
    %cst_15 = arith.constant dense<0.000000e+00> : vector<8x128xf32>
    %33 = tpu.matmul %31, %32, %cst_15 {dimension_numbers = #tpu.dot_dimension_numbers<[1], [0], [0], [1], [0, 0, 1, 1], [], []>} : vector<8x128xbf16>, vector<128x128xbf16>, vector<8x128xf32> -> vector<8x128xf32>
    %cst_16 = arith.constant dense<0.000000e+00> : vector<128xf32>
    %34 = vector.multi_reduction <add>, %33, %cst_16 [0] : vector<8x128xf32> to vector<128xf32>
    %35 = vector.shape_cast %34 : vector<128xf32> to vector<1x128xf32>
    %cst_17 = arith.constant 8.000000e+00 : f32
    %36 = vector.broadcast %cst_17 : f32 to vector<1x128xf32>
    %37 = arith.divf %35, %36 : vector<1x128xf32>
    %38 = arith.mulf %33, %33 : vector<8x128xf32>
    %cst_18 = arith.constant dense<0.000000e+00> : vector<128xf32>
    %39 = vector.multi_reduction <add>, %38, %cst_18 [0] : vector<8x128xf32> to vector<128xf32>
    %40 = vector.shape_cast %39 : vector<128xf32> to vector<1x128xf32>
    %cst_19 = arith.constant 8.000000e+00 : f32
    %41 = vector.broadcast %cst_19 : f32 to vector<1x128xf32>
    %42 = arith.divf %40, %41 : vector<1x128xf32>
    %43 = arith.mulf %37, %37 : vector<1x128xf32>
    %44 = arith.subf %42, %43 : vector<1x128xf32>
    %cst_20 = arith.constant 0.000000e+00 : f32
    %45 = vector.broadcast %cst_20 : f32 to vector<1x128xf32>
    %46 = arith.maximumf %44, %45 : vector<1x128xf32>
    %c0_21 = arith.constant 0 : index
    %c0_22 = arith.constant 0 : index
    %47 = vector.load %arg4[%c0_21, %c0_22] : memref<2x128xf32, #tpu.memory_space<vmem>>, vector<1x128xf32>
    %cst_23 = arith.constant 9.99999974E-6 : f32
    %48 = vector.broadcast %cst_23 : f32 to vector<1x128xf32>
    %49 = arith.addf %46, %48 : vector<1x128xf32>
    %50 = math.rsqrt %49 : vector<1x128xf32>
    %51 = arith.mulf %47, %50 : vector<1x128xf32>
    %c1_24 = arith.constant 1 : index
    %c0_25 = arith.constant 0 : index
    %52 = vector.load %arg4[%c1_24, %c0_25] : memref<2x128xf32, #tpu.memory_space<vmem>>, vector<1x128xf32>
    %53 = arith.mulf %37, %51 : vector<1x128xf32>
    %54 = arith.subf %52, %53 : vector<1x128xf32>
    %55 = vector.broadcast %51 : vector<1x128xf32> to vector<8x128xf32>
    %56 = arith.mulf %33, %55 : vector<8x128xf32>
    %57 = vector.broadcast %54 : vector<1x128xf32> to vector<8x128xf32>
    %58 = arith.addf %56, %57 : vector<8x128xf32>
    %cst_26 = arith.constant 0.000000e+00 : f32
    %59 = vector.broadcast %cst_26 : f32 to vector<8x128xf32>
    %60 = arith.maximumf %58, %59 : vector<8x128xf32>
    %61 = arith.truncf %60 : vector<8x128xf32> to vector<8x128xbf16>
    %c0_27 = arith.constant 0 : index
    %c0_28 = arith.constant 0 : index
    %62 = vector.load %arg5[%c0_27, %c0_28] : memref<128x128xbf16, #tpu.memory_space<vmem>>, vector<128x128xbf16>
    %cst_29 = arith.constant dense<0.000000e+00> : vector<8x128xf32>
    %63 = tpu.matmul %61, %62, %cst_29 {dimension_numbers = #tpu.dot_dimension_numbers<[1], [0], [0], [1], [0, 0, 1, 1], [], []>} : vector<8x128xbf16>, vector<128x128xbf16>, vector<8x128xf32> -> vector<8x128xf32>
    %c0_30 = arith.constant 0 : index
    %c0_31 = arith.constant 0 : index
    %64 = vector.load %arg6[%c0_30, %c0_31] : memref<1x128xf32, #tpu.memory_space<vmem>>, vector<1x128xf32>
    %65 = vector.broadcast %64 : vector<1x128xf32> to vector<8x128xf32>
    %66 = arith.addf %63, %65 : vector<8x128xf32>
    %cst_32 = arith.constant 0.000000e+00 : f32
    %67 = vector.broadcast %cst_32 : f32 to vector<8x128xf32>
    %68 = arith.subf %67, %66 : vector<8x128xf32>
    %69 = math.exp %68 : vector<8x128xf32>
    %cst_33 = arith.constant 1.000000e+00 : f32
    %70 = vector.broadcast %cst_33 : f32 to vector<8x128xf32>
    %71 = arith.addf %70, %69 : vector<8x128xf32>
    %cst_34 = arith.constant 1.000000e+00 : f32
    %72 = vector.broadcast %cst_34 : f32 to vector<8x128xf32>
    %73 = arith.divf %72, %71 : vector<8x128xf32>
    %74 = tpu.iota {dimensions = array<i32: 1>} : vector<8x128xi32>
    %c4_i32 = arith.constant 4 : i32
    %75 = vector.broadcast %c4_i32 : i32 to vector<8x128xi32>
    %76 = arith.cmpi sge, %74, %75 : vector<8x128xi32>
    %c9_i32 = arith.constant 9 : i32
    %77 = vector.broadcast %c9_i32 : i32 to vector<8x128xi32>
    %78 = arith.cmpi slt, %74, %77 : vector<8x128xi32>
    %79 = arith.andi %76, %78 : vector<8x128xi1>
    %cst_35 = arith.constant -1.000000e+30 : f32
    %80 = vector.broadcast %cst_35 : f32 to vector<8x128xf32>
    %81 = arith.select %79, %66, %80 : vector<8x128xi1>, vector<8x128xf32>
    %cst_36 = arith.constant dense<0xFF800000> : vector<8xf32>
    %82 = vector.multi_reduction <maximumf>, %81, %cst_36 [1] : vector<8x128xf32> to vector<8xf32>
    %83 = vector.shape_cast %82 : vector<8xf32> to vector<8x1xf32>
    %84 = vector.broadcast %83 : vector<8x1xf32> to vector<8x128xf32>
    %85 = arith.subf %81, %84 : vector<8x128xf32>
    %86 = math.exp %85 : vector<8x128xf32>
    %cst_37 = arith.constant dense<0.000000e+00> : vector<8xf32>
    %87 = vector.multi_reduction <add>, %86, %cst_37 [1] : vector<8x128xf32> to vector<8xf32>
    %88 = vector.shape_cast %87 : vector<8xf32> to vector<8x1xf32>
    %89 = vector.broadcast %88 : vector<8x1xf32> to vector<8x128xf32>
    %90 = arith.divf %86, %89 : vector<8x128xf32>
    %91 = arith.select %79, %90, %73 : vector<8x128xi1>, vector<8x128xf32>
    %c0_38 = arith.constant 0 : index
    %c0_39 = arith.constant 0 : index
    %92 = vector.load %arg7[%c0_38, %c0_39] : memref<8x128xf32, #tpu.memory_space<vmem>>, vector<8x128xf32>
    tpu.vector_store %arg7[%c0_38, %c0_39], %91 {strides = array<i32>} : memref<8x128xf32, #tpu.memory_space<vmem>>, vector<8x128xf32>,
    return
  }
}

</mosaic_0001>

<bundles_post_ra>
// kernel: _forward_impl.1
= control target key start
LH: loop header
LB: loop body
LE: loop exit
PB: predicated region body
PF: predicated region fallthrough
CT: control target
= control target key end

     0   :  { %12 = vsyncpa [#allocation3], 0  ;;  %s753_s0 = inlined_call_operand.hbm [shape: f32[8,16], index: 0, kind: input, shape index: {}]   ;;  %s754_s1 = inlined_call_operand.hbm [shape: bf16[16,128], index: 1, kind: input, shape index: {}]   ;;  %s755_s2 = inlined_call_operand.hbm [shape: f32[2,128], index: 2, kind: input, shape index: {}]   ;;  %s756_s3 = inlined_call_operand.hbm [shape: bf16[128,128], index: 3, kind: input, shape index: {}]   ;;  %s757_s4 = inlined_call_operand.vmem [shape: f32[2,128], index: 4, kind: input, shape index: {}]   ;;  %s758_s5 = inlined_call_operand.hbm [shape: bf16[128,128], index: 5, kind: input, shape index: {}]   ;;  %s759_s6 = inlined_call_operand.vmem [shape: f32[1,128], index: 6, kind: input, shape index: {}]   ;;  %s760_s7 = inlined_call_operand.vmem [shape: f32[8,128], index: 7, kind: output, shape index: {}]  }
   0x1   :  { %13 = vsyncpa [#allocation5], 0  ;;  %s30_s26 = sshll.u32 %s754_s1, 4  ;;  %s31_s26 = int_to_ptr.hbm [resolvable:$true] %s30_s26 }
   0x2   :  { %14 = vsyncpa [#allocation8], 0  ;;  %s664_s27 = smov [#allocation4]   ;;  %s54_s8 = sshll.u32 %s756_s3, 4  ;;  %s55_s8 = int_to_ptr.hbm [resolvable:$true] %s54_s8 }
   0x3   :  { %s32_s28 = sshll.u32 %s664_s27, 4  ;;  %s665_s9 = smov 64   ;;  %s33_s28 = int_to_ptr.vmem [resolvable:$true] %s32_s28 }
   0x4   :  { %s666_s10 = smov 4   ;;  %s667_s11 = smov [#allocation7]  }
   0x5   :  { %38 = dma.hbm_to_vmem [thread:$0]  %s31_s26, 128, %s33_s28, [#allocation5], %s665_s9, %s665_s9, %s666_s10  }
   0x6   :  { %s56_s12 = sshll.u32 %s667_s11, 4  ;;  %s20_s15 = sshll.u32 %s753_s0, 4  ;;  %s57_s12 = int_to_ptr.vmem [resolvable:$true] %s56_s12  ;;  %s21_s15 = int_to_ptr.hbm [resolvable:$true] %s20_s15 }
   0x7   :  { %62 = dma.hbm_to_vmem [thread:$0]  %s55_s8, 1024, %s57_s12, [#allocation8], %s665_s9, %s665_s9, %s666_s10  }
   0x8   :  { %s44_s17 = sshll.u32 %s755_s2, 4  ;;  %s668_s18 = smov [#allocation2]   ;;  %s45_s17 = int_to_ptr.hbm [resolvable:$true] %s44_s17 }
   0x9   :  { %s22_s19 = sshll.u32 %s668_s18, 4  ;;  %s669_s3 = smov [#allocation6]   ;;  %s23_s19 = int_to_ptr.vmem [resolvable:$true] %s22_s19 }
   0xa   :  { %25 = dma.hbm_to_vmem [thread:$0]  %s21_s15, 128, %s23_s19, [#allocation3]  }
   0xb   :  { %s46_s20 = sshll.u32 %s669_s3, 4  ;;  %s69_s23 = sshll.u32 %s758_s5, 4  ;;  %s47_s20 = int_to_ptr.vmem [resolvable:$true] %s46_s20  ;;  %s70_s23 = int_to_ptr.hbm [resolvable:$true] %s69_s23 }
   0xc   :  { %49 = dma.hbm_to_vmem [thread:$0]  %s45_s17, 32, %s47_s20, [#allocation5]  }
   0xd   :  { %s670_s0 = smov [#allocation9]  }
   0xe   :  { %s71_s24 = sshll.u32 %s670_s0, 4  ;;  %s72_s24 = int_to_ptr.vmem [resolvable:$true] %s71_s24 }
   0xf   :  { %77 = dma.hbm_to_vmem [thread:$0]  %s70_s23, 1024, %s72_s24, [#allocation8], %s665_s9, %s665_s9, %s666_s10  }
  0x10   :  { %658 = dma.done.wait [#allocation3], 128  }
  0x11   :  { %659 = vsyncadd [#allocation3], 4294967168 }
  0x12   :  { %660 = dma.done.wait [#allocation5], 160  }
  0x13   :  { %661 = vsyncadd [#allocation5], 4294967136 }
  0x14   :  { %662 = dma.done.wait [#allocation8], 2048  }
  0x15   :  { %663 = vsyncadd [#allocation8], 4294965248  ;;  %v498_v0 = vld [vmem:[#allocation4] sm:$0xff]  ;;  %v101_v1 = vld [vmem:[#allocation2] sm:$0xff]  ;;  %vm111_vm0 = vcmask 130048   ;;  %v671_v5 = vmov 8.0  }
  0x16   :  { %v102_v2 = vpack.c.bf16 %v101_v1, %v101_v1  ;;  %122 = vmatpush.bf16.msra.mxu0 %v498_v0  ;;  %v506_v3 = vld [vmem:[#allocation7 + $0x38] sm:$0xff]  ;;  %v505_v4 = vld [vmem:[#allocation7 + $0x30] sm:$0xff]  ;;  %524 = vrcp.f32 %v671_v5  ;;  %v504_v6 = vld [vmem:[#allocation7 + $0x28] sm:$0xff] }
  0x17   :  { %239 = vmatpush.bf16.msra.mxu1 %v506_v3  ;;  %v503_v8 = vld [vmem:[#allocation7 + $0x20] sm:$0xff]  ;;  %v502_v10 = vld [vmem:[#allocation7 + $0x18] sm:$0xff]  ;;  %v501_v12 = vld [vmem:[#allocation7 + $0x10] sm:$0xff] }
  0x18   :  { %v500_v19 = vld [vmem:[#allocation7 + $0x8] sm:$0xff]  ;;  %v499_v25 = vld [vmem:[#allocation7] sm:$0xff]  ;;  %v153_v44 = vld [vmem:[#allocation6] sm:$0x1] }
  0x19   :  { %433 = vmatmul.msk.bf16.vlgmr.msra.gmra.mxu0 %vm111_vm0, %v102_v2  ;;  %v166_v48 = vld [vmem:[#allocation6 + $0x1] sm:$0x1]  ;;  %v513_v58 = vld [vmem:[#allocation9 + $0x30] sm:$0xff]  ;;  %v512_v59 = vld [vmem:[#allocation9 + $0x28] sm:$0xff] }
  0x1a   :  { %v514_v57 = vld [vmem:[#allocation9 + $0x38] sm:$0xff]  ;;  %v511_v60 = vld [vmem:[#allocation9 + $0x20] sm:$0xff]  ;;  %v509_v1 = vld [vmem:[#allocation9 + $0x10] sm:$0xff] }
  0x1b   :  { %240 = vmatpush.bf16.msra.mxu1 %v505_v4  ;;  %360 = vmatpush.bf16.msra.mxu2 %v514_v57  ;;  %v510_v61 = vld [vmem:[#allocation9 + $0x18] sm:$0xff] }
  0x1c   :  { %v525_v7 = vpop.eup %524 }
  0x1d   :  { %v135_v9 = vmul.f32 8.0, %v525_v7  ;;  %vm139_vm1 = vweird.f32 %v525_v7 }
  0x1f   :  { %241 = vmatpush.bf16.msra.mxu1 %v504_v6  ;;  %v136_v11 = vsub.f32 1.0, %v135_v9  ;;  %361 = vmatpush.bf16.msra.mxu2 %v513_v58  ;;  %v508_v6 = vld [vmem:[#allocation9 + $0x8] sm:$0xff] }
  0x21   :  { %v137_v16 = vmul.f32 %v525_v7, %v136_v11 }
  0x23   :  { %242 = vmatpush.bf16.msra.mxu1 %v503_v8  ;;  %v138_v22 = vadd.f32 %v525_v7, %v137_v16  ;;  %362 = vmatpush.bf16.msra.mxu2 %v512_v59 }
  0x25   :  { %v727_v29 = vsel %vm139_vm1, %v525_v7, %v138_v22 }
  0x27   :  { %243 = vmatpush.bf16.msra.mxu1 %v502_v10  ;;  %363 = vmatpush.bf16.msra.mxu2 %v511_v60 }
  0x2b   :  { %244 = vmatpush.bf16.msra.mxu1 %v501_v12  ;;  %364 = vmatpush.bf16.msra.mxu2 %v510_v61  ;;  %v507_v12 = vld [vmem:[#allocation9] sm:$0xff] }
  0x2f   :  { %245 = vmatpush.bf16.msra.mxu1 %v500_v19  ;;  %365 = vmatpush.bf16.msra.mxu2 %v509_v1 }
  0x33   :  { %246 = vmatpush.bf16.msra.mxu1 %v499_v25  ;;  %366 = vmatpush.bf16.msra.mxu2 %v508_v6 }
  0x37   :  { %367 = vmatpush.bf16.msra.mxu2 %v507_v12 }
  0x96   :  { %v124_v13 = vpop.f32.mrf.mxu0 }
  0x97   :  { %v128_v14 = vrot.slane %v124_v13, 4  ;;  %v142_v15 = vmul.f32 %v124_v13, %v124_v13 }
  0x99   :  { %v129_v17 = vadd.f32 %v128_v14, %v124_v13  ;;  %v143_v18 = vrot.slane %v142_v15, 4 }
  0x9b   :  { %v130_v20 = vrot.slane %v129_v17, 2  ;;  %v144_v21 = vadd.f32 %v143_v18, %v142_v15 }
  0x9d   :  { %v131_v23 = vadd.f32 %v130_v20, %v129_v17  ;;  %v145_v24 = vrot.slane %v144_v21, 2 }
  0x9e   :  { %v126_v26 = vpop.f32.mrf.mxu0 }
  0x9f   :  { %v132_v27 = vrot.slane %v131_v23, 1  ;;  %v146_v28 = vadd.f32 %v145_v24, %v144_v21 }
  0xa1   :  { %v133_v30 = vadd.f32 %v132_v27, %v131_v23  ;;  %v147_v31 = vrot.slane %v146_v28, 1  ;;  %v270_v27 = vld [vmem:[%s757_s4] sm:$0x1] }
  0xa3   :  { %v148_v32 = vadd.f32 %v147_v31, %v146_v28  ;;  %v141_v33 = vmul.f32 %v727_v29, %v133_v30  ;;  %v283_v31 = vld [vmem:[%s757_s4 + $0x1] sm:$0x1] }
  0xa5   :  { %v149_v34 = vmul.f32 %v148_v32, %v727_v29  ;;  %v150_v35 = vmul.f32 %v141_v33, %v141_v33 }
  0xa7   :  { %v151_v36 = vsub.f32 %v149_v34, %v150_v35 }
  0xa9   :  { %v152_v37 = vmax.f32 %v151_v36, 0.0 }
  0xab   :  { %v154_v38 = vadd.f32 1e-05, %v152_v37 }
  0xad   :  { %526 = vrsqrt.f32 %v154_v38  ;;  %vm161_vm3 = vweird.f32 %v154_v38 }
  0xb3   :  { %v527_v39 = vpop.eup %526 }
  0xb4   :  { %v156_v40 = vmul.f32 %v527_v39, %v154_v38  ;;  %vm162_vm2 = vweird.f32 %v527_v39 }
  0xb5   :  { %vm163_vm4 = vmor %vm161_vm3, %vm162_vm2 }
  0xb6   :  { %v157_v41 = vmul.f32 %v527_v39, %v156_v40  ;;  %v392_v40 = vlaneseq }
  0xb8   :  { %v158_v42 = vmul.f32 0.5, %v157_v41  ;;  %v393_v41 = vand.u32 127, %v392_v40 }
  0xba   :  { %v159_v43 = vsub.f32 1.5, %v158_v42  ;;  %v523_v42 = vld [vmem:[%s759_s6] ss:$0 sm:$0xff]  ;;  %vm394_vm8 = vcmp.ge.s32.totalorder %v393_v41, 4  ;;  %vm395_vm9 = vcmp.lt.s32.totalorder %v393_v41, 9 }
  0xbb   :  { %vm742_vm10 = vmand %vm394_vm8, %vm395_vm9 }
  0xbc   :  { %v160_v45 = vmul.f32 %v527_v39, %v159_v43 }
  0xbe   :  { %v164_v46 = vsel %vm163_vm4, %v527_v39, %v160_v45 }
  0xbf   :  { %v165_v47 = vmul.f32 %v164_v46, %v153_v44 }
  0xc1   :  { %v167_v49 = vmul.f32 %v165_v47, %v141_v33  ;;  %v169_v50 = vperm.slane %v165_v47, 0 }
  0xc3   :  { %v168_v51 = vsub.f32 %v166_v48, %v167_v49  ;;  %v170_v52 = vmul.f32 %v169_v50, %v124_v13 }
  0xc5   :  { %v171_v53 = vperm.slane %v168_v51, 0 }
  0xc7   :  { %v172_v54 = vadd.f32 %v171_v53, %v170_v52 }
  0xc9   :  { %v173_v55 = vmax.f32 %v172_v54, 0.0 }
  0xcb   :  { %v174_v56 = vpack.c.bf16 %v173_v55, %v173_v55 }
  0xcd   :  { %247 = vmatmul.bf16.vlgmr.msra.gmra.mxu1 %v174_v56 }
 0x14a   :  { %v248_v62 = vpop.f32.mrf.mxu1 }
 0x14b   :  { %v252_v63 = vrot.slane %v248_v62, 4  ;;  %v259_v0 = vmul.f32 %v248_v62, %v248_v62 }
 0x14d   :  { %v253_v2 = vadd.f32 %v252_v63, %v248_v62  ;;  %v260_v3 = vrot.slane %v259_v0, 4 }
 0x14f   :  { %v254_v4 = vrot.slane %v253_v2, 2  ;;  %v261_v5 = vadd.f32 %v260_v3, %v259_v0 }
 0x151   :  { %v255_v7 = vadd.f32 %v254_v4, %v253_v2  ;;  %v262_v8 = vrot.slane %v261_v5, 2 }
 0x152   :  { %v250_v9 = vpop.f32.mrf.mxu1 }
 0x153   :  { %v256_v10 = vrot.slane %v255_v7, 1  ;;  %v263_v11 = vadd.f32 %v262_v8, %v261_v5 }
 0x155   :  { %v257_v13 = vadd.f32 %v256_v10, %v255_v7  ;;  %v264_v14 = vrot.slane %v263_v11, 1 }
 0x157   :  { %v265_v15 = vadd.f32 %v264_v14, %v263_v11  ;;  %v258_v16 = vmul.f32 %v257_v13, %v727_v29 }
 0x159   :  { %v266_v17 = vmul.f32 %v265_v15, %v727_v29  ;;  %v267_v18 = vmul.f32 %v258_v16, %v258_v16 }
 0x15b   :  { %v268_v19 = vsub.f32 %v266_v17, %v267_v18 }
 0x15d   :  { %v269_v20 = vmax.f32 %v268_v19, 0.0 }
 0x15f   :  { %v271_v21 = vadd.f32 1e-05, %v269_v20 }
 0x161   :  { %528 = vrsqrt.f32 %v271_v21  ;;  %vm278_vm6 = vweird.f32 %v271_v21 }
 0x167   :  { %v529_v22 = vpop.eup %528 }
 0x168   :  { %v273_v23 = vmul.f32 %v529_v22, %v271_v21  ;;  %vm279_vm5 = vweird.f32 %v529_v22 }
 0x169   :  { %vm280_vm7 = vmor %vm278_vm6, %vm279_vm5 }
 0x16a   :  { %v274_v24 = vmul.f32 %v529_v22, %v273_v23 }
 0x16c   :  { %v275_v25 = vmul.f32 0.5, %v274_v24 }
 0x16e   :  { %v276_v26 = vsub.f32 1.5, %v275_v25 }
 0x170   :  { %v277_v28 = vmul.f32 %v529_v22, %v276_v26 }
 0x172   :  { %v281_v30 = vsel %vm280_vm7, %v529_v22, %v277_v28 }
 0x173   :  { %v282_v29 = vmul.f32 %v281_v30, %v270_v27 }
 0x175   :  { %v284_v32 = vmul.f32 %v282_v29, %v258_v16  ;;  %v286_v33 = vperm.slane %v282_v29, 0 }
 0x177   :  { %v285_v34 = vsub.f32 %v283_v31, %v284_v32  ;;  %v287_v35 = vmul.f32 %v286_v33, %v248_v62 }
 0x179   :  { %v288_v36 = vperm.slane %v285_v34, 0 }
 0x17b   :  { %v289_v37 = vadd.f32 %v288_v36, %v287_v35 }
 0x17d   :  { %v290_v38 = vmax.f32 %v289_v37, 0.0 }
 0x17f   :  { %v291_v39 = vpack.c.bf16 %v290_v38, %v290_v38 }
 0x181   :  { %368 = vmatmul.bf16.vlgmr.msra.gmra.mxu2 %v291_v39 }
 0x204   :  { %v369_v43 = vpop.f32.mrf.mxu2 }
 0x205   :  { %v370_v45 = vadd.f32 %v523_v42, %v369_v43 }
 0x207   :  { %v397_v46 = vsel %vm742_vm10, %v370_v45, -1e+30  ;;  %v373_v52 = vsub.f32 0.0, %v370_v45 }
 0x208   :  { %398 = vmax.xlane.f32.xlu0 %v397_v46 }
 0x209   :  { %v374_v53 = vmul.f32 1.442695, %v373_v52 }
 0x20c   :  { %v371_v47 = vpop.f32.mrf.mxu2 }
 0x27b   :  { %v399_v48 = vpop.xlane.xlu0 %398 }
 0x27c   :  { %v400_v49 = vsub.f32 %v397_v46, %v399_v48 }
 0x27e   :  { %v401_v50 = vmul.f32 1.442695, %v400_v49 }
 0x280   :  { %530 = vpow2.f32 %v401_v50 }
 0x281   :  { %532 = vpow2.f32 %v374_v53 }
 0x286   :  { %v531_v51 = vpop.eup %530 }
 0x287   :  { %403 = vadd.xlane.f32.xlu0 %v531_v51  ;;  %v533_v54 = vpop.eup %532 }
 0x288   :  { %v376_v55 = vadd.f32 1.0, %v533_v54 }
 0x28a   :  { %534 = vrcp.f32 %v376_v55  ;;  %vm382_vm13 = vweird.f32 %v376_v55  ;;  %v388_v4 = vand.u32 2147483648, %v376_v55  ;;  %v386_v5 = vand.u32 2147483647, %v376_v55 }
 0x28c   :  { %v389_v10 = vor.u32 1.1754944e-38, %v388_v4  ;;  %vm387_vm2 = vcmp.eq.f32.partialorder %v386_v5, 8.507059e+37 }
 0x290   :  { %v535_v56 = vpop.eup %534 }
 0x291   :  { %v378_v57 = vmul.f32 %v535_v56, %v376_v55  ;;  %vm383_vm11 = vweird.f32 %v535_v56 }
 0x292   :  { %vm384_vm14 = vmor %vm382_vm13, %vm383_vm11 }
 0x293   :  { %v379_v59 = vsub.f32 1.0, %v378_v57 }
 0x295   :  { %v380_v61 = vmul.f32 %v535_v56, %v379_v59 }
 0x297   :  { %v381_v1 = vadd.f32 %v535_v56, %v380_v61 }
 0x299   :  { %v385_v8 = vsel %vm384_vm14, %v535_v56, %v381_v1 }
 0x29a   :  { %v390_v13 = vsel %vm387_vm2, %v389_v10, %v385_v8 }
 0x2fa   :  { %v404_v58 = vpop.xlane.xlu0 %403 }
 0x2fb   :  { %536 = vrcp.f32 %v404_v58  ;;  %v416_v0 = vand.u32 2147483648, %v404_v58  ;;  %v414_v3 = vand.u32 2147483647, %v404_v58  ;;  %vm410_vm15 = vweird.f32 %v404_v58 }
 0x2fd   :  { %v417_v7 = vor.u32 1.1754944e-38, %v416_v0  ;;  %vm415_vm1 = vcmp.eq.f32.partialorder %v414_v3, 8.507059e+37 }
 0x301   :  { %v537_v60 = vpop.eup %536 }
 0x302   :  { %v406_v62 = vmul.f32 %v537_v60, %v404_v58  ;;  %vm411_vm12 = vweird.f32 %v537_v60 }
 0x303   :  { %vm412_vm0 = vmor %vm410_vm15, %vm411_vm12 }
 0x304   :  { %v407_v63 = vsub.f32 1.0, %v406_v62 }
 0x306   :  { %v408_v2 = vmul.f32 %v537_v60, %v407_v63 }
 0x308   :  { %v409_v6 = vadd.f32 %v537_v60, %v408_v2 }
 0x30a   :  { %v413_v9 = vsel %vm412_vm0, %v537_v60, %v409_v6 }
 0x30b   :  { %v418_v11 = vsel %vm415_vm1, %v417_v7, %v413_v9 }
 0x30c   :  { %v419_v12 = vmul.f32 %v531_v51, %v418_v11 }
 0x30e   :  { %v420_v14 = vsel %vm742_vm10, %v419_v12, %v390_v13 }
 0x30f   :  { %421 = vst [vmem:[%s760_s7] sm:$0xff] %v420_v14 }
 0x310   :  { %426 = vsyncpa [#allocation3], 1 }
 0x311   :  { %427 = vsyncpa [#allocation5], 1 }
 0x312   :  { %428 = vsyncpa [#allocation8], 1 }

</bundles_post_ra>
